<compile_context>
chip_gen: v7x
topology: tpu7x:2x2x1
jax: 0.10.0
libtpu: 0.0.40
codegen_flags: <defaults>
</compile_context>

<pallas_src>
import jax
import jax.numpy as jnp
from jax.experimental import pallas as pl
from jax.experimental.pallas import tpu as pltpu


def _round_up(n, m):
    return ((n + m - 1) // m) * m


def _pad2(a, rows, cols):
    pr, pc = rows - a.shape[0], cols - a.shape[1]
    if pr or pc:
        a = jnp.pad(a, ((0, pr), (0, pc)))
    return a


def sae_kernel(x_ref, we_ref, be_ref, wd_ref, bd_ref, dec_ref, enc_ref, acc_ref):
    """Fused encoder + decoder for one (batch tile, hidden tile) grid step.

    x_ref  : (TB, Dp)   input tile (resident across the hidden axis)
    we_ref : (Dp, TH)   encoder weight tile (in x out layout)
    be_ref : (1, TH)    encoder bias tile
    wd_ref : (TH, Dp)   decoder weight tile (in x out layout)
    bd_ref : (1, Dp)    decoder bias (full)
    dec_ref: (TB, Dp)   decoded output tile (written on last hidden step)
    enc_ref: (TB, TH)   encoded output tile (written every hidden step)
    acc_ref: (TB, Dp)   f32 decoder accumulator (VMEM scratch)
    """
    h_idx = pl.program_id(1)

    @pl.when(h_idx == 0)
    def _():
        acc_ref[...] = jnp.zeros_like(acc_ref)

    # Encoder: Linear + ReLU for this hidden tile (MXU, f32 accumulation).
    pre = jnp.dot(x_ref[...], we_ref[...], preferred_element_type=jnp.float32)
    pre = pre + be_ref[...]
    enc = jnp.maximum(pre, 0.0)
    enc_ref[...] = enc.astype(enc_ref.dtype)

    # Decoder: accumulate this hidden tile's contribution.
    acc_ref[...] += jnp.dot(enc.astype(wd_ref.dtype), wd_ref[...],
                            preferred_element_type=jnp.float32)

    @pl.when(h_idx == pl.num_programs(1) - 1)
    def _():
        d = acc_ref[...] + bd_ref[...]
        dec_ref[...] = jnp.maximum(d, 0.0).astype(dec_ref.dtype)


def sae_forward(x, w_enc, b_enc, w_dec, b_dec, *, tb=256, th=256):
    """Run the SAE forward pass with a Pallas kernel.

    x     : (B, D)
    w_enc : (H, D)  -- PyTorch nn.Linear layout (out, in)
    b_enc : (H,)
    w_dec : (D, H)
    b_dec : (D,)
    Returns (decoded (B, D), encoded (B, H)).
    """
    B, D = x.shape
    H = w_enc.shape[0]
    dtype = x.dtype

    # Tile / pad sizes.  Last dims -> multiples of 128 (lane-dense stores);
    # batch tile -> at most `tb`, but never more padding than one sublane
    # quantum (8) beyond the real batch when B is small.
    tb = min(tb, max(_round_up(B, 8), 8))
    th = min(th, _round_up(H, 128))
    B_pad = _round_up(B, tb)
    D_pad = _round_up(D, 128)
    H_pad = _round_up(H, th)

    x_p = _pad2(jnp.asarray(x), B_pad, D_pad)
    we_t = _pad2(jnp.asarray(w_enc).T, D_pad, H_pad)          # (Dp, Hp)
    wd_t = _pad2(jnp.asarray(w_dec).T, H_pad, D_pad)          # (Hp, Dp)
    be2 = _pad2(jnp.asarray(b_enc).reshape(1, H), 1, H_pad)   # (1, Hp)
    bd2 = _pad2(jnp.asarray(b_dec).reshape(1, D), 1, D_pad)   # (1, Dp)

    grid = (B_pad // tb, H_pad // th)

    itemsize = jnp.dtype(dtype).itemsize
    cost = pl.CostEstimate(
        flops=4 * B_pad * D_pad * H_pad,          # encoder + decoder matmuls
        transcendentals=0,
        bytes_accessed=itemsize * (B_pad * D_pad * 2      # x in, decoded out
                                   + B_pad * H_pad        # encoded out
                                   + 2 * D_pad * H_pad    # both weights
                                   + D_pad + H_pad),      # biases
    )

    dec, enc = pl.pallas_call(
        sae_kernel,
        out_shape=(
            jax.ShapeDtypeStruct((B_pad, D_pad), dtype),
            jax.ShapeDtypeStruct((B_pad, H_pad), dtype),
        ),
        grid_spec=pltpu.PrefetchScalarGridSpec(
            num_scalar_prefetch=0,
            grid=grid,
            in_specs=[
                pl.BlockSpec((tb, D_pad), lambda i, h: (i, 0)),   # x tile (resident over h)
                pl.BlockSpec((D_pad, th), lambda i, h: (0, h)),   # encoder weight tile
                pl.BlockSpec((1, th), lambda i, h: (0, h)),       # encoder bias tile
                pl.BlockSpec((th, D_pad), lambda i, h: (h, 0)),   # decoder weight tile
                pl.BlockSpec((1, D_pad), lambda i, h: (0, 0)),    # decoder bias
            ],
            out_specs=[
                pl.BlockSpec((tb, D_pad), lambda i, h: (i, 0)),   # decoded (written at last h)
                pl.BlockSpec((tb, th), lambda i, h: (i, h)),      # encoded
            ],
            scratch_shapes=[pltpu.VMEM((tb, D_pad), jnp.float32)],
        ),
        compiler_params=pltpu.CompilerParams(
            dimension_semantics=("parallel", "arbitrary"),
            vmem_limit_bytes=48 * 1024 * 1024,
        ),
        cost_estimate=cost,
    )(x_p, we_t, be2, wd_t, bd2)

    return dec[:B, :D], enc[:B, :H]


def _init_params(key, input_dim, hidden_dim, dtype=jnp.float32):
    """Deterministic init mimicking torch.nn.Linear default (uniform +-1/sqrt(fan_in))."""
    k1, k2, k3, k4 = jax.random.split(key, 4)
    bound_e = 1.0 / jnp.sqrt(input_dim)
    bound_d = 1.0 / jnp.sqrt(hidden_dim)
    w_enc = jax.random.uniform(k1, (hidden_dim, input_dim), dtype, -bound_e, bound_e)
    b_enc = jax.random.uniform(k2, (hidden_dim,), dtype, -bound_e, bound_e)
    w_dec = jax.random.uniform(k3, (input_dim, hidden_dim), dtype, -bound_d, bound_d)
    b_dec = jax.random.uniform(k4, (input_dim,), dtype, -bound_d, bound_d)
    return w_enc, b_enc, w_dec, b_dec


if __name__ == "__main__":
    key = jax.random.PRNGKey(0)
    kx, kp = jax.random.split(key)

    B, INPUT_DIM, HIDDEN_DIM = 16, 64, 32
    x = jax.random.normal(kx, (B, INPUT_DIM), jnp.float32)
    w_enc, b_enc, w_dec, b_dec = _init_params(kp, INPUT_DIM, HIDDEN_DIM)

    dec, enc = sae_forward(x, w_enc, b_enc, w_dec, b_dec)
    dec = jax.block_until_ready(dec)
    enc = jax.block_until_ready(enc)

    # Pure-JAX reference check of the forward semantics (f32 operands -> tight tol).
    enc_ref = jnp.maximum(x @ w_enc.T + b_enc, 0.0)
    dec_ref = jnp.maximum(enc_ref @ w_dec.T + b_dec, 0.0)
    assert dec.shape == (B, INPUT_DIM) and enc.shape == (B, HIDDEN_DIM)
    assert jnp.allclose(enc, enc_ref, atol=1e-5, rtol=1e-5)
    assert jnp.allclose(dec, dec_ref, atol=1e-5, rtol=1e-5)

    print("KERNEL_OK")
</pallas_src>

<mosaic_0001>
module attributes {stable_mosaic.version = 11 : i64} {
  func.func @sae_kernel(%arg0: i32, %arg1: i32, %arg2: memref<16x128xf32, #tpu.memory_space<vmem>>, %arg3: memref<128x128xf32, #tpu.memory_space<vmem>>, %arg4: memref<1x128xf32, #tpu.memory_space<vmem>>, %arg5: memref<128x128xf32, #tpu.memory_space<vmem>>, %arg6: memref<1x128xf32, #tpu.memory_space<vmem>>, %arg7: memref<16x128xf32, #tpu.memory_space<vmem>>, %arg8: memref<16x128xf32, #tpu.memory_space<vmem>>, %arg9: memref<16x128xf32, #tpu.memory_space<vmem>>) attributes {dimension_semantics = [#tpu.dimension_semantics<parallel>, #tpu.dimension_semantics<arbitrary>], iteration_bounds = array<i64: 1, 1>, scalar_prefetch = 0 : i64, scratch_operands = 1 : i64, tpu.core_type = #tpu.core_type<tc>, window_params = [{transform_indices = @transform_0, window_bounds = array<i64: 16, 128>}, {transform_indices = @transform_1, window_bounds = array<i64: 128, 128>}, {transform_indices = @transform_2, window_bounds = array<i64: 1, 128>}, {transform_indices = @transform_3, window_bounds = array<i64: 128, 128>}, {pipeline_mode = #tpu.pipeline_mode<synchronous>, transform_indices = @transform_4, window_bounds = array<i64: 1, 128>}, {transform_indices = @transform_5, window_bounds = array<i64: 16, 128>}, {transform_indices = @transform_6, window_bounds = array<i64: 16, 128>}]} {
    %c0_i32 = arith.constant 0 : i32
    %0 = arith.cmpi eq, %arg1, %c0_i32 : i32
    %1 = arith.extui %0 : i1 to i32
    %c0_i32_0 = arith.constant 0 : i32
    %2 = arith.cmpi ne, %1, %c0_i32_0 : i32
    scf.if %2 {
      %cst_18 = arith.constant 0.000000e+00 : f32
      %20 = vector.broadcast %cst_18 : f32 to vector<16x128xf32>
      %c0_19 = arith.constant 0 : index
      %c0_20 = arith.constant 0 : index
      %21 = vector.load %arg9[%c0_19, %c0_20] : memref<16x128xf32, #tpu.memory_space<vmem>>, vector<16x128xf32>
      tpu.vector_store %arg9[%c0_19, %c0_20], %20 {strides = array<i32>} : memref<16x128xf32, #tpu.memory_space<vmem>>, vector<16x128xf32>,
    } else {
    }
    %c0 = arith.constant 0 : index
    %c0_1 = arith.constant 0 : index
    %3 = vector.load %arg2[%c0, %c0_1] : memref<16x128xf32, #tpu.memory_space<vmem>>, vector<16x128xf32>
    %c0_2 = arith.constant 0 : index
    %c0_3 = arith.constant 0 : index
    %4 = vector.load %arg3[%c0_2, %c0_3] : memref<128x128xf32, #tpu.memory_space<vmem>>, vector<128x128xf32>
    %cst = arith.constant dense<0.000000e+00> : vector<16x128xf32>
    %5 = tpu.matmul %3, %4, %cst {dimension_numbers = #tpu.dot_dimension_numbers<[1], [0], [0], [1], [0, 0, 1, 1], [], []>} : vector<16x128xf32>, vector<128x128xf32>, vector<16x128xf32> -> vector<16x128xf32>
    %c0_4 = arith.constant 0 : index
    %c0_5 = arith.constant 0 : index
    %6 = vector.load %arg4[%c0_4, %c0_5] : memref<1x128xf32, #tpu.memory_space<vmem>>, vector<1x128xf32>
    %7 = vector.broadcast %6 : vector<1x128xf32> to vector<16x128xf32>
    %8 = arith.addf %5, %7 : vector<16x128xf32>
    %cst_6 = arith.constant 0.000000e+00 : f32
    %9 = vector.broadcast %cst_6 : f32 to vector<16x128xf32>
    %10 = arith.maximumf %8, %9 : vector<16x128xf32>
    %c0_7 = arith.constant 0 : index
    %c0_8 = arith.constant 0 : index
    %11 = vector.load %arg8[%c0_7, %c0_8] : memref<16x128xf32, #tpu.memory_space<vmem>>, vector<16x128xf32>
    tpu.vector_store %arg8[%c0_7, %c0_8], %10 {strides = array<i32>} : memref<16x128xf32, #tpu.memory_space<vmem>>, vector<16x128xf32>,
    %c0_9 = arith.constant 0 : index
    %c0_10 = arith.constant 0 : index
    %12 = vector.load %arg9[%c0_9, %c0_10] : memref<16x128xf32, #tpu.memory_space<vmem>>, vector<16x128xf32>
    %c0_11 = arith.constant 0 : index
    %c0_12 = arith.constant 0 : index
    %13 = vector.load %arg5[%c0_11, %c0_12] : memref<128x128xf32, #tpu.memory_space<vmem>>, vector<128x128xf32>
    %cst_13 = arith.constant dense<0.000000e+00> : vector<16x128xf32>
    %14 = tpu.matmul %10, %13, %cst_13 {dimension_numbers = #tpu.dot_dimension_numbers<[1], [0], [0], [1], [0, 0, 1, 1], [], []>} : vector<16x128xf32>, vector<128x128xf32>, vector<16x128xf32> -> vector<16x128xf32>
    %15 = arith.addf %12, %14 : vector<16x128xf32>
    %c0_14 = arith.constant 0 : index
    %c0_15 = arith.constant 0 : index
    %16 = vector.load %arg9[%c0_14, %c0_15] : memref<16x128xf32, #tpu.memory_space<vmem>>, vector<16x128xf32>
    tpu.vector_store %arg9[%c0_14, %c0_15], %15 {strides = array<i32>} : memref<16x128xf32, #tpu.memory_space<vmem>>, vector<16x128xf32>,
    %c0_i32_16 = arith.constant 0 : i32
    %17 = arith.cmpi eq, %arg1, %c0_i32_16 : i32
    %18 = arith.extui %17 : i1 to i32
    %c0_i32_17 = arith.constant 0 : i32
    %19 = arith.cmpi ne, %18, %c0_i32_17 : i32
    scf.if %19 {
      %c0_18 = arith.constant 0 : index
      %c0_19 = arith.constant 0 : index
      %20 = vector.load %arg9[%c0_18, %c0_19] : memref<16x128xf32, #tpu.memory_space<vmem>>, vector<16x128xf32>
      %c0_20 = arith.constant 0 : index
      %c0_21 = arith.constant 0 : index
      %21 = vector.load %arg6[%c0_20, %c0_21] : memref<1x128xf32, #tpu.memory_space<vmem>>, vector<1x128xf32>
      %22 = vector.broadcast %21 : vector<1x128xf32> to vector<16x128xf32>
      %23 = arith.addf %20, %22 : vector<16x128xf32>
      %cst_22 = arith.constant 0.000000e+00 : f32
      %24 = vector.broadcast %cst_22 : f32 to vector<16x128xf32>
      %25 = arith.maximumf %23, %24 : vector<16x128xf32>
      %c0_23 = arith.constant 0 : index
      %c0_24 = arith.constant 0 : index
      %26 = vector.load %arg7[%c0_23, %c0_24] : memref<16x128xf32, #tpu.memory_space<vmem>>, vector<16x128xf32>
      tpu.vector_store %arg7[%c0_23, %c0_24], %25 {strides = array<i32>} : memref<16x128xf32, #tpu.memory_space<vmem>>, vector<16x128xf32>,
    } else {
    }
    return
  }
  func.func @transform_0(%arg0: i32, %arg1: i32) -> (i32, i32) {
    %c0_i32 = arith.constant 0 : i32
    %c0_i32_0 = arith.constant 0 : i32
    return %arg0, %c0_i32 : i32, i32
  }
  func.func @transform_1(%arg0: i32, %arg1: i32) -> (i32, i32) {
    %c0_i32 = arith.constant 0 : i32
    %c0_i32_0 = arith.constant 0 : i32
    return %c0_i32, %arg1 : i32, i32
  }
  func.func @transform_2(%arg0: i32, %arg1: i32) -> (i32, i32) {
    %c0_i32 = arith.constant 0 : i32
    %c0_i32_0 = arith.constant 0 : i32
    return %c0_i32, %arg1 : i32, i32
  }
  func.func @transform_3(%arg0: i32, %arg1: i32) -> (i32, i32) {
    %c0_i32 = arith.constant 0 : i32
    %c0_i32_0 = arith.constant 0 : i32
    return %arg1, %c0_i32 : i32, i32
  }
  func.func @transform_4(%arg0: i32, %arg1: i32) -> (i32, i32) {
    %c0_i32 = arith.constant 0 : i32
    %c0_i32_0 = arith.constant 0 : i32
    %c0_i32_1 = arith.constant 0 : i32
    return %c0_i32, %c0_i32_0 : i32, i32
  }
  func.func @transform_5(%arg0: i32, %arg1: i32) -> (i32, i32) {
    %c0_i32 = arith.constant 0 : i32
    %c0_i32_0 = arith.constant 0 : i32
    return %arg0, %c0_i32 : i32, i32
  }
  func.func @transform_6(%arg0: i32, %arg1: i32) -> (i32, i32) {
    %c0_i32 = arith.constant 0 : i32
    return %arg0, %arg1 : i32, i32
  }
}

</mosaic_0001>

<bundles_post_ra>
// kernel: tpu_custom_call.1
= control target key start
LH: loop header
LB: loop body
LE: loop exit
PB: predicated region body
PF: predicated region fallthrough
CT: control target
= control target key end

     0   :  { %12 = vsyncpa [#allocation4], 0  ;;  %s751_s0 = inlined_call_operand.hbm [shape: f32[16,128], index: 0, kind: input, shape index: {}]   ;;  %s752_s1 = inlined_call_operand.hbm [shape: f32[128,128], index: 1, kind: input, shape index: {}]   ;;  %s753_s2 = inlined_call_operand.vmem [shape: f32[1,128], index: 2, kind: input, shape index: {}]   ;;  %s754_s3 = inlined_call_operand.hbm [shape: f32[128,128], index: 3, kind: input, shape index: {}]   ;;  %s755_s4 = inlined_call_operand.vmem [shape: f32[1,128], index: 4, kind: input, shape index: {}]   ;;  %s756_s5 = inlined_call_operand.hbm [shape: f32[16,128], index: 5, kind: output, shape index: {0}]   ;;  %s757_s6 = inlined_call_operand.hbm [shape: f32[16,128], index: 6, kind: output, shape index: {1}]  }
   0x1   :  { %13 = vsyncpa [#allocation7], 0 }
   0x2   :  { %14 = vsyncpa [#allocation5], 0 }
   0x3   :  { %15 = vsyncpa [#allocation11], 0  ;;  %s621_s21 = smov [#allocation6]   ;;  %s622_s23 = smov [#allocation3]  }
   0x4   :  { %s33_s22 = sshll.u32 %s621_s21, 4  ;;  %s21_s24 = sshll.u32 %s622_s23, 4  ;;  %s34_s22 = int_to_ptr.vmem [resolvable:$true] %s33_s22  ;;  %s663_s24 = int_to_ptr.vmem [resolvable:$true] %s21_s24 }
   0x5   :  { %s503_s27 = scalar_lea.hbm %s752_s1, 2048 }
   0x6   :  { %p504_p0 = scmp.ne.s32.totalorder %s752_s1, %s503_s27  ;;  %p507_p1 = scmp.lt.u32.totalorder %s503_s27, %s752_s1 }
   0x8   :  { %p509_p2 = pnand %p507_p1, %p504_p0 }
   0xa   :  { %512 = shalt.err (!%p509_p2)
}
   0xb   :  { %s513_s8 = scalar_lea.vmem %s34_s22, 2048  ;;  %p518_p4 = scmp.lt.s32.totalorder %s34_s22, %s34_s22 }
   0xc   :  { %p514_p3 = scmp.ne.s32.totalorder %s34_s22, %s513_s8  ;;  %p519_p5 = scmp.lt.s32.totalorder %s513_s8, %s513_s8 }
   0xe   :  { %p520_p6 = por %p519_p5, %p518_p4 }
  0x10   :  { %p521_p7 = pnand %p520_p6, %p514_p3 }
  0x12   :  { %524 = shalt.err (!%p521_p7)
}
  0x13   :  { %s623_s9 = smov 128   ;;  %s624_s10 = smov 8  }
  0x14   :  { %39 = dma.hbm_to_vmem [thread:$0]  %s752_s1, 2048, %s34_s22, [#allocation7], %s623_s9, %s623_s9, %s624_s10  }
  0x15   :  { %s525_s15 = scalar_lea.hbm %s751_s0, 256 }
  0x16   :  { %p526_p8 = scmp.ne.s32.totalorder %s751_s0, %s525_s15  ;;  %p529_p9 = scmp.lt.u32.totalorder %s525_s15, %s751_s0 }
  0x18   :  { %p531_p10 = pnand %p529_p9, %p526_p8 }
  0x1a   :  { %534 = shalt.err (!%p531_p10)
}
  0x1b   :  { %s535_s20 = scalar_lea.vmem %s663_s24, 256  ;;  %p540_p12 = scmp.lt.s32.totalorder %s663_s24, %s663_s24 }
  0x1c   :  { %p536_p11 = scmp.ne.s32.totalorder %s663_s24, %s535_s20  ;;  %p541_p13 = scmp.lt.s32.totalorder %s535_s20, %s535_s20 }
  0x1e   :  { %p542_p0 = por %p541_p13, %p540_p12 }
  0x20   :  { %p543_p1 = pnand %p542_p0, %p536_p11 }
  0x22   :  { %546 = shalt.err (!%p543_p1)
}
  0x23   :  { %27 = dma.hbm_to_vmem [thread:$0]  %s751_s0, 256, %s663_s24, [#allocation4], %s623_s9, %s623_s9, %s624_s10  }
  0x24   :  { %s625_s22 = smov [#allocation8]   ;;  %s547_s27 = scalar_lea.hbm %s754_s3, 2048 }
  0x25   :  { %s47_s23 = sshll.u32 %s625_s22, 4  ;;  %p548_p2 = scmp.ne.s32.totalorder %s754_s3, %s547_s27  ;;  %s48_s23 = int_to_ptr.vmem [resolvable:$true] %s47_s23 }
  0x26   :  { %p551_p3 = scmp.lt.u32.totalorder %s547_s27, %s754_s3 }
  0x28   :  { %p553_p4 = pnand %p551_p3, %p548_p2 }
  0x2a   :  { %556 = shalt.err (!%p553_p4)
}
  0x2b   :  { %s557_s8 = scalar_lea.vmem %s48_s23, 2048  ;;  %p562_p6 = scmp.lt.s32.totalorder %s48_s23, %s48_s23 }
  0x2c   :  { %p558_p5 = scmp.ne.s32.totalorder %s48_s23, %s557_s8  ;;  %p563_p7 = scmp.lt.s32.totalorder %s557_s8, %s557_s8 }
  0x2e   :  { %p564_p8 = por %p563_p7, %p562_p6 }
  0x30   :  { %p565_p9 = pnand %p564_p8, %p558_p5 }
  0x32   :  { %568 = shalt.err (!%p565_p9)
}
  0x33   :  { %53 = dma.hbm_to_vmem [thread:$0]  %s754_s3, 2048, %s48_s23, [#allocation7], %s623_s9, %s623_s9, %s624_s10  }
  0x34   :  { %613 = dma.done.wait [#allocation4], 256  }
  0x35   :  { %614 = vsyncadd [#allocation4], 4294967040 }
  0x36   :  { %615 = dma.done.wait [#allocation7], 4096  }
  0x37   :  { %616 = vsyncadd [#allocation7], 4294963200  ;;  %v73_v0 = vld [vmem:[#allocation6] sm:$0xff]  ;;  %v74_v1 = vld [vmem:[#allocation6 + $0x8] sm:$0xff]  ;;  %s626_s12 = smov [#allocation10]  }
  0x38   :  { %v75_v2 = vld [vmem:[#allocation6 + $0x10] sm:$0xff]  ;;  %v432_v3 = vpack.c.bf16 %v74_v1, %v73_v0  ;;  %v76_v4 = vld [vmem:[#allocation6 + $0x18] sm:$0xff]  ;;  %v77_v6 = vld [vmem:[#allocation6 + $0x20] sm:$0xff]  ;;  %s307_s13 = sshll.u32 %s626_s12, 4  ;;  %s308_s13 = int_to_ptr.vmem [resolvable:$true] %s307_s13 }
  0x39   :  { %v436_v5 = vpack.c.bf16 %v76_v4, %v75_v2  ;;  %v78_v7 = vld [vmem:[#allocation6 + $0x28] sm:$0xff]  ;;  %v79_v9 = vld [vmem:[#allocation6 + $0x30] sm:$0xff]  ;;  %v80_v10 = vld [vmem:[#allocation6 + $0x38] sm:$0xff]  ;;  %s569_s14 = scalar_lea.vmem %s308_s13, 256  ;;  %p574_p11 = scmp.lt.s32.totalorder %s308_s13, %s308_s13 }
  0x3a   :  { %433 = vmatprep.subr.bf16.mxu0 %v432_v3  ;;  %v440_v8 = vpack.c.bf16 %v78_v7, %v77_v6  ;;  %v71_v11 = vld [vmem:[#allocation3] sm:$0xff]  ;;  %v177_v12 = vld [vmem:[#allocation8] sm:$0xff]  ;;  %v178_v13 = vld [vmem:[#allocation8 + $0x8] sm:$0xff]  ;;  %v444_v20 = vpack.c.bf16 %v80_v10, %v79_v9  ;;  %p570_p10 = scmp.ne.s32.totalorder %s308_s13, %s569_s14  ;;  %p575_p12 = scmp.lt.s32.totalorder %s569_s14, %s569_s14 }
  0x3b   :  { %435 = vmatpush3.bf16.msra.mxu0 %v432_v3  ;;  %394 = vmatprep.mubr.f32.mxu0 %v71_v11  ;;  %v179_v14 = vld [vmem:[#allocation8 + $0x10] sm:$0xff]  ;;  %v464_v15 = vpack.c.bf16 %v178_v13, %v177_v12  ;;  %v180_v16 = vld [vmem:[#allocation8 + $0x18] sm:$0xff]  ;;  %v181_v18 = vld [vmem:[#allocation8 + $0x20] sm:$0xff] }
  0x3c   :  { %437 = vmatprep.subr.bf16.mxu0 %v436_v5  ;;  %v468_v17 = vpack.c.bf16 %v180_v16, %v179_v14  ;;  %v182_v19 = vld [vmem:[#allocation8 + $0x28] sm:$0xff]  ;;  %v81_v21 = vld [vmem:[#allocation6 + $0x40] sm:$0xff]  ;;  %v183_v24 = vld [vmem:[#allocation8 + $0x30] sm:$0xff]  ;;  %p576_p13 = por %p575_p12, %p574_p11 }
  0x3d   :  { %465 = vmatprep.subr.bf16.mxu1 %v464_v15  ;;  %v82_v22 = vld [vmem:[#allocation6 + $0x48] sm:$0xff]  ;;  %v472_v23 = vpack.c.bf16 %v182_v19, %v181_v18  ;;  %v184_v25 = vld [vmem:[#allocation8 + $0x38] sm:$0xff]  ;;  %v83_v27 = vld [vmem:[#allocation6 + $0x50] sm:$0xff] }
  0x3e   :  { %467 = vmatpush3.bf16.msra.mxu1 %v464_v15  ;;  %v448_v26 = vpack.c.bf16 %v82_v22, %v81_v21  ;;  %v84_v28 = vld [vmem:[#allocation6 + $0x58] sm:$0xff]  ;;  %v476_v29 = vpack.c.bf16 %v184_v25, %v183_v24  ;;  %v185_v30 = vld [vmem:[#allocation8 + $0x40] sm:$0xff]  ;;  %v186_v31 = vld [vmem:[#allocation8 + $0x48] sm:$0xff]  ;;  %p577_p0 = pnand %p576_p13, %p570_p10 }
  0x3f   :  { %439 = vmatpush3.bf16.msra.mxu0 %v436_v5  ;;  %469 = vmatprep.subr.bf16.mxu1 %v468_v17  ;;  %v452_v32 = vpack.c.bf16 %v84_v28, %v83_v27  ;;  %v85_v33 = vld [vmem:[#allocation6 + $0x60] sm:$0xff]  ;;  %v86_v34 = vld [vmem:[#allocation6 + $0x68] sm:$0xff]  ;;  %v480_v35 = vpack.c.bf16 %v186_v31, %v185_v30  ;;  %v187_v36 = vld [vmem:[#allocation8 + $0x50] sm:$0xff] }
  0x40   :  { %441 = vmatprep.subr.bf16.mxu0 %v440_v8  ;;  %v188_v37 = vld [vmem:[#allocation8 + $0x58] sm:$0xff]  ;;  %v456_v38 = vpack.c.bf16 %v86_v34, %v85_v33  ;;  %v87_v39 = vld [vmem:[#allocation6 + $0x70] sm:$0xff]  ;;  %v189_v42 = vld [vmem:[#allocation8 + $0x60] sm:$0xff] }
  0x41   :  { %v88_v40 = vld [vmem:[#allocation6 + $0x78] sm:$0xff]  ;;  %v484_v41 = vpack.c.bf16 %v188_v37, %v187_v36  ;;  %v190_v43 = vld [vmem:[#allocation8 + $0x68] sm:$0xff]  ;;  %v191_v47 = vld [vmem:[#allocation8 + $0x70] sm:$0xff] }
  0x42   :  { %471 = vmatpush3.bf16.msra.mxu1 %v468_v17  ;;  %v460_v44 = vpack.c.bf16 %v88_v40, %v87_v39  ;;  %v488_v45 = vpack.c.bf16 %v190_v43, %v189_v42  ;;  %v72_v46 = vld [vmem:[#allocation3 + $0x8] sm:$0xff]  ;;  %v324_v50 = vld [vmem:[%s753_s2] ss:$0 sm:$0xff] }
  0x43   :  { %443 = vmatpush3.bf16.msra.mxu0 %v440_v8  ;;  %473 = vmatprep.subr.bf16.mxu1 %v472_v23  ;;  %v192_v48 = vld [vmem:[#allocation8 + $0x78] sm:$0xff] }
  0x44   :  { %445 = vmatprep.subr.bf16.mxu0 %v444_v20  ;;  %v492_v49 = vpack.c.bf16 %v192_v48, %v191_v47 }
  0x46   :  { %475 = vmatpush3.bf16.msra.mxu1 %v472_v23 }
  0x47   :  { %447 = vmatpush3.bf16.msra.mxu0 %v444_v20  ;;  %477 = vmatprep.subr.bf16.mxu1 %v476_v29 }
  0x48   :  { %449 = vmatprep.subr.bf16.mxu0 %v448_v26 }
  0x4a   :  { %479 = vmatpush3.bf16.msra.mxu1 %v476_v29 }
  0x4b   :  { %451 = vmatpush3.bf16.msra.mxu0 %v448_v26  ;;  %481 = vmatprep.subr.bf16.mxu1 %v480_v35 }
  0x4c   :  { %453 = vmatprep.subr.bf16.mxu0 %v452_v32 }
  0x4e   :  { %483 = vmatpush3.bf16.msra.mxu1 %v480_v35 }
  0x4f   :  { %455 = vmatpush3.bf16.msra.mxu0 %v452_v32  ;;  %485 = vmatprep.subr.bf16.mxu1 %v484_v41 }
  0x50   :  { %457 = vmatprep.subr.bf16.mxu0 %v456_v38 }
  0x52   :  { %487 = vmatpush3.bf16.msra.mxu1 %v484_v41 }
  0x53   :  { %459 = vmatpush3.bf16.msra.mxu0 %v456_v38  ;;  %489 = vmatprep.subr.bf16.mxu1 %v488_v45 }
  0x54   :  { %461 = vmatprep.subr.bf16.mxu0 %v460_v44 }
  0x56   :  { %491 = vmatpush3.bf16.msra.mxu1 %v488_v45 }
  0x57   :  { %463 = vmatpush3.bf16.msra.mxu0 %v460_v44  ;;  %493 = vmatprep.subr.bf16.mxu1 %v492_v49 }
  0x5a   :  { %395 = vmatmul.mubr.f32.vlgmr.msra.gmra.mrb[0].mxu0 %v72_v46  ;;  %495 = vmatpush3.bf16.msra.mxu1 %v492_v49 }
 0x12d   :  { %v396_v51 = vpop.f32.mrb[0].mxu0 }
 0x12e   :  { %v168_v52 = vadd.f32 %v396_v51, %v324_v50  ;;  %v162_v53 = vpop.f32.mrb[1].mxu0 }
 0x12f   :  { %v163_v54 = vadd.f32 %v324_v50, %v162_v53 }
 0x130   :  { %v172_v55 = vmax.f32 %v168_v52, 0.0 }
 0x131   :  { %v171_v56 = vmax.f32 %v163_v54, 0.0 }
 0x132   :  { %174 = vst [vmem:[#allocation10 + $0x8] sm:$0xff] %v172_v55 }
 0x133   :  { %173 = vst [vmem:[#allocation10] sm:$0xff] %v171_v56  ;;  %429 = vmatprep.mubr.f32.mxu1 %v171_v56 }
 0x134   :  { %430 = vmatmul.mubr.f32.vlgmr.msra.gmra.mrb[0].mxu1 %v172_v55 }
 0x135   :  { %580 = shalt.err (!%p577_p0)
}
 0x136   :  { %s581_s16 = scalar_lea.hbm %s757_s6, 256 }
 0x137   :  { %p582_p1 = scmp.ne.s32.totalorder %s757_s6, %s581_s16  ;;  %p585_p2 = scmp.lt.u32.totalorder %s581_s16, %s757_s6 }
 0x139   :  { %p587_p3 = pnand %p585_p2, %p582_p1 }
 0x13b   :  { %590 = shalt.err (!%p587_p3)
}
 0x13c   :  { %313 = dma.vmem_to_hbm [thread:$0]  %s308_s13, 256, %s757_s6, [#allocation11], %s623_s9, %s623_s9, %s624_s10  }
 0x13d   :  { %v325_v57 = vld [vmem:[%s755_s4] ss:$0 sm:$0xff]  ;;  %s627_s25 = smov [#allocation9]  }
 0x13e   :  { %s295_s26 = sshll.u32 %s627_s25, 4  ;;  %s296_s26 = int_to_ptr.vmem [resolvable:$true] %s295_s26 }
 0x13f   :  { %s591_s27 = scalar_lea.vmem %s296_s26, 256  ;;  %p596_p5 = scmp.lt.s32.totalorder %s296_s26, %s296_s26 }
 0x140   :  { %p592_p4 = scmp.ne.s32.totalorder %s296_s26, %s591_s27  ;;  %p597_p6 = scmp.lt.s32.totalorder %s591_s27, %s591_s27 }
 0x142   :  { %p598_p7 = por %p597_p6, %p596_p5 }
 0x144   :  { %p599_p8 = pnand %p598_p7, %p592_p4 }
 0x207   :  { %v431_v58 = vpop.f32.mrb[0].mxu1 }
 0x208   :  { %v285_v59 = vadd.f32 %v431_v58, %v325_v57  ;;  %v259_v60 = vpop.f32.mrb[1].mxu1 }
 0x209   :  { %v284_v61 = vadd.f32 %v325_v57, %v259_v60 }
 0x20a   :  { %v287_v62 = vmax.f32 %v285_v59, 0.0 }
 0x20b   :  { %v286_v63 = vmax.f32 %v284_v61, 0.0 }
 0x20c   :  { %289 = vst [vmem:[#allocation9 + $0x8] sm:$0xff] %v287_v62 }
 0x20d   :  { %288 = vst [vmem:[#allocation9] sm:$0xff] %v286_v63 }
 0x20e   :  { %602 = shalt.err (!%p599_p8)
}
 0x20f   :  { %s603_s28 = scalar_lea.hbm %s756_s5, 256 }
 0x210   :  { %p604_p9 = scmp.ne.s32.totalorder %s756_s5, %s603_s28  ;;  %p607_p10 = scmp.lt.u32.totalorder %s603_s28, %s756_s5 }
 0x212   :  { %p609_p11 = pnand %p607_p10, %p604_p9 }
 0x214   :  { %612 = shalt.err (!%p609_p11)
}
 0x215   :  { %301 = dma.vmem_to_hbm [thread:$0]  %s296_s26, 256, %s756_s5, [#allocation5], %s623_s9, %s623_s9, %s624_s10  }
 0x216   :  { %617 = dma.done.wait [#allocation5], 256  }
 0x217   :  { %618 = vsyncadd [#allocation5], 4294967040 }
 0x218   :  { %619 = dma.done.wait [#allocation11], 256  }
 0x219   :  { %620 = vsyncadd [#allocation11], 4294967040 }
 0x21a   :  { %320 = vsyncpa [#allocation4], 1 }
 0x21b   :  { %321 = vsyncpa [#allocation7], 1 }
 0x21c   :  { %322 = vsyncpa [#allocation5], 1 }
 0x21d   :  { %323 = vsyncpa [#allocation11], 1 }

</bundles_post_ra>
